<compile_context>
chip_gen: v6e
topology: v6e:2x2x1
jax: 0.10.0
libtpu: 0.0.40
codegen_flags: <defaults>
</compile_context>

<pallas_src>
import jax
import jax.numpy as jnp
from jax.experimental import pallas as pl
from jax.experimental.pallas import tpu as pltpu


MAX_BLOCK_BYTES = 6 * 1024 * 1024     # per-buffer block target (review: 4-6 MiB)
VMEM_LIMIT_BYTES = 48 * 1024 * 1024   # sized for v7x's 64 MiB VMEM ceiling
MIN_DMA_ROW_BYTES = 4096              # keep contiguous HBM runs >= 4 KiB


def _round_up(v, m):
    return ((v + m - 1) // m) * m


def _trim_copy_kernel(x_ref, o_ref):
    # x_ref: (row_tile, t_block_in), o_ref: (row_tile, t_block_out) with
    # t_block_out <= t_block_in.  Copy the leading t_block_out lanes.
    o_ref[...] = x_ref[:, : o_ref.shape[-1]]


def trim_padding_1d(x: jax.Array, trim_size: int, *,
                    max_block_bytes: int = MAX_BLOCK_BYTES) -> jax.Array:
    """Removes the last `trim_size` elements along the time (last) dim."""
    n, c, t = x.shape
    assert 0 <= trim_size < t, "require 0 <= trim_size < time dimension"
    t_out = t - trim_size

    r = n * c
    x2 = x.reshape(r, t)
    itemsize = jnp.dtype(x.dtype).itemsize

    # dtype-scaled lane tile: >= 4 KiB contiguous per row per DMA descriptor.
    lane_tile = _round_up(max(128, MIN_DMA_ROW_BYTES // itemsize), 128)

    # Widest input time block that still skips the trimmed tail (128-aligned).
    t_in_full = min(t, _round_up(t_out, 128))

    if t_in_full * itemsize * 8 <= max_block_bytes:
        # Single full-width time block: one contiguous HBM run per row, no
        # ragged time block, fewest grid steps.  Kernel slices the aligned
        # tail off in VMEM.
        t_block_in, t_block_out = t_in_full, t_out
        num_t_blocks = 1
        read_cols = t_in_full
    else:
        # Long time axis: lane-tiled.  In/out blocks share width and block
        # index; only the last ragged output block needs masked stores.  The
        # matching input block may extend past column t (Pallas clamps ragged
        # edge blocks; those lanes are masked off on the output side).
        t_block_in = t_block_out = lane_tile
        num_t_blocks = pl.cdiv(t_out, lane_tile)
        read_cols = min(num_t_blocks * lane_tile, t)

    # Rows per block: as large as possible under the per-buffer budget,
    # rounded DOWN to a 32-multiple (sublane packing) when possible.
    bytes_per_row = max(t_block_in, t_block_out) * itemsize
    row_tile = max(1, max_block_bytes // bytes_per_row)
    if row_tile >= r:
        row_tile = r
    elif row_tile >= 32:
        row_tile = (row_tile // 32) * 32
    else:
        row_tile = max(8, (row_tile // 8) * 8)
    num_row_blocks = pl.cdiv(r, row_tile)

    # v7x has 2 TensorCores: give the 'parallel' grid >= 2 blocks for
    # medium/large copies so both cores drive DMA streams.
    if (num_row_blocks * num_t_blocks == 1 and r >= 64
            and r * t_out * itemsize >= (1 << 20)):
        row_tile = _round_up(pl.cdiv(r, 2), 32)
        if row_tile < r:
            num_row_blocks = pl.cdiv(r, row_tile)

    cost = pl.CostEstimate(
        flops=0,
        transcendentals=0,
        bytes_accessed=int((r * read_cols + r * t_out) * itemsize),
    )

    out2 = pl.pallas_call(
        _trim_copy_kernel,
        out_shape=jax.ShapeDtypeStruct((r, t_out), x.dtype),
        grid_spec=pl.GridSpec(
            grid=(num_row_blocks, num_t_blocks),
            in_specs=[pl.BlockSpec((row_tile, t_block_in), lambda i, j: (i, j))],
            out_specs=pl.BlockSpec((row_tile, t_block_out), lambda i, j: (i, j)),
        ),
        compiler_params=pltpu.CompilerParams(
            dimension_semantics=("parallel", "parallel"),
            vmem_limit_bytes=VMEM_LIMIT_BYTES,
        ),
        cost_estimate=cost,
    )(x2)

    return out2.reshape(n, c, t_out)


if __name__ == "__main__":
    key = jax.random.PRNGKey(0)
    k1, k2 = jax.random.split(key)

    # Spec-sized check: (N, C, T) = (2, 4, 16), trim 3.
    x = jax.random.normal(key, (2, 4, 16), dtype=jnp.float32)
    out = trim_padding_1d(x, 3)
    jax.block_until_ready(out)
    assert out.shape == (2, 4, 13), out.shape
    assert jnp.array_equal(out, x[:, :, :-3]), "mismatch vs reference slice"

    # Full-width path, bf16, non-128-multiple T_out.
    xb = jax.random.normal(k1, (1, 2, 3000), dtype=jnp.bfloat16)
    outb = trim_padding_1d(xb, 10)
    jax.block_until_ready(outb)
    assert jnp.array_equal(outb, xb[:, :, :-10]), "bf16 mismatch"

    # Force the lane-tiled long path (ragged last time block past column T),
    # covering the reviewer's clamping concern (t=3000, trim=10).
    xc = jax.random.normal(k2, (1, 4, 3000), dtype=jnp.float32)
    outc = trim_padding_1d(xc, 10, max_block_bytes=32 * 1024)
    jax.block_until_ready(outc)
    assert jnp.array_equal(outc, xc[:, :, :-10]), "lane-tiled path mismatch"

    print("KERNEL_OK")
</pallas_src>

<mosaic_0001>
module attributes {stable_mosaic.version = 11 : i64} {
  func.func @_trim_copy_kernel(%arg0: i32, %arg1: i32, %arg2: memref<8x16xf32, #tpu.memory_space<vmem>>, %arg3: memref<8x13xf32, #tpu.memory_space<vmem>>) attributes {dimension_semantics = [#tpu.dimension_semantics<parallel>, #tpu.dimension_semantics<parallel>], iteration_bounds = array<i64: 1, 1>, scalar_prefetch = 0 : i64, scratch_operands = 0 : i64, tpu.core_type = #tpu.core_type<tc>, window_params = [{transform_indices = @transform_0, window_bounds = array<i64: 8, 16>}, {transform_indices = @transform_1, window_bounds = array<i64: 8, 13>}]} {
    %c0 = arith.constant 0 : index
    %c0_0 = arith.constant 0 : index
    %0 = vector.load %arg2[%c0, %c0_0] : memref<8x16xf32, #tpu.memory_space<vmem>>, vector<8x13xf32>
    %c0_1 = arith.constant 0 : index
    %c0_2 = arith.constant 0 : index
    %1 = vector.load %arg3[%c0_1, %c0_2] : memref<8x13xf32, #tpu.memory_space<vmem>>, vector<8x13xf32>
    tpu.vector_store %arg3[%c0_1, %c0_2], %0 {strides = array<i32>} : memref<8x13xf32, #tpu.memory_space<vmem>>, vector<8x13xf32>,
    return
  }
  func.func @transform_0(%arg0: i32, %arg1: i32) -> (i32, i32) {
    %c0_i32 = arith.constant 0 : i32
    return %arg0, %arg1 : i32, i32
  }
  func.func @transform_1(%arg0: i32, %arg1: i32) -> (i32, i32) {
    %c0_i32 = arith.constant 0 : i32
    return %arg0, %arg1 : i32, i32
  }
}

</mosaic_0001>

<bundles_post_ra>
// kernel: tpu_custom_call.1
= control target key start
LH: loop header
LB: loop body
LE: loop exit
PB: predicated region body
PF: predicated region fallthrough
CT: control target
= control target key end

     0   :  { %6 = vsyncpa [#allocation3], 0  ;;  %s103_s0 = inlined_call_operand.hbm [shape: f32[8,16], index: 0, kind: input, shape index: {}]   ;;  %s104_s1 = inlined_call_operand.hbm [shape: f32[8,13], index: 1, kind: output, shape index: {}]  }
   0x1   :  { %7 = vsyncpa [#allocation4], 0  ;;  %s85_s6 = smov [#allocation2]  }
   0x2   :  { %s14_s7 = sshll.u32 %s85_s6, 4  ;;  %s15_s7 = int_to_ptr.vmem [resolvable:$true] %s14_s7 }
   0x3   :  { %s49_s8 = scalar_lea.vmem %s15_s7, 128  ;;  %p54_p1 = scmp.lt.s32.totalorder %s15_s7, %s15_s7 }
   0x4   :  { %p50_p0 = scmp.ne.s32.totalorder %s15_s7, %s49_s8  ;;  %p55_p2 = scmp.lt.s32.totalorder %s49_s8, %s49_s8 }
   0x6   :  { %p56_p3 = por %p55_p2, %p54_p1 }
   0x8   :  { %p57_p4 = pnand %p56_p3, %p50_p0 }
   0xa   :  { %60 = shalt.err (!%p57_p4)
}
   0xb   :  { %17 = dma.hbm_to_vmem [thread:$0]  %s103_s0, 128, %s15_s7, [#allocation3]  }
   0xc   :  { %81 = dma.done.wait [#allocation3], 128  }
   0xd   :  { %82 = vsyncadd [#allocation3], 4294967168  ;;  %s86_s11 = smov [#allocation5]   ;;  %vm22_vm0 = vcmask 105472   ;;  %v21_v0 = vld [vmem:[#allocation2] sm:$0xff] }
   0xe   :  { %s30_s12 = sshll.u32 %s86_s11, 4  ;;  %23 = vst.msk [vmem:[#allocation5] sm:$0xff] %vm22_vm0, %v21_v0  ;;  %s31_s12 = int_to_ptr.vmem [resolvable:$true] %s30_s12 }
   0xf   :  { %s61_s13 = scalar_lea.vmem %s31_s12, 128  ;;  %p66_p6 = scmp.lt.s32.totalorder %s31_s12, %s31_s12 }
  0x10   :  { %p62_p5 = scmp.ne.s32.totalorder %s31_s12, %s61_s13  ;;  %p67_p7 = scmp.lt.s32.totalorder %s61_s13, %s61_s13 }
  0x12   :  { %p68_p8 = por %p67_p7, %p66_p6 }
  0x14   :  { %p69_p9 = pnand %p68_p8, %p62_p5 }
  0x16   :  { %72 = shalt.err (!%p69_p9)
}
  0x17   :  { %33 = dma.vmem_to_hbm [thread:$0]  %s31_s12, 128, %s104_s1, [#allocation4]  }
  0x18   :  { %83 = dma.done.wait [#allocation4], 128  }
  0x19   :  { %84 = vsyncadd [#allocation4], 4294967168 }
  0x1a   :  { %37 = vsyncpa [#allocation3], 1 }
  0x1b   :  { %38 = vsyncpa [#allocation4], 1 }

</bundles_post_ra>
